<compile_context>
chip_gen: v6e
topology: v6e:2x2x1
jax: 0.10.0
libtpu: 0.0.40
codegen_flags: <defaults>
</compile_context>

<pallas_src>
import functools

import jax
import jax.numpy as jnp
from jax import lax
from jax.experimental import pallas as pl
from jax.experimental.pallas import tpu as pltpu


def _round_up(x, m):
    return ((x + m - 1) // m) * m


def _fscore_kernel(out_ref, tgt_ref, res_ref, acc_ref, *,
                   threshold, beta2, eps, num_classes, dense_target,
                   n_rows, tile_n, steps_per_chunk):
    ch = pl.program_id(0)          # parallel chunk axis (megacore on v7x)
    i = pl.program_id(1)           # reduction axis within the chunk

    @pl.when(i == 0)
    def _init():
        acc_ref[0] = jnp.float32(0.0)
        acc_ref[1] = jnp.float32(0.0)
        acc_ref[2] = jnp.float32(0.0)

    # Row-validity mask: handles the ragged last tile and chunk steps that
    # fall entirely past the batch end (their block index was clamped in the
    # index_map; the mask zeroes any contribution, including NaN garbage).
    step = ch * steps_per_chunk + i
    row0 = step * tile_n
    row_ids = row0 + lax.broadcasted_iota(jnp.int32, (tile_n, 1), 0)
    row_valid = row_ids < n_rows                              # (tile_n, 1)

    x = out_ref[...].astype(jnp.float32)                      # (tile_n, C)
    y_pred = (x >= jnp.float32(threshold)).astype(jnp.float32)
    pred_sum = jnp.sum(y_pred, axis=1, keepdims=True)         # (tile_n, 1)

    if dense_target:
        y_true = tgt_ref[...].astype(jnp.float32)             # (tile_n, C)
        tp = jnp.sum(y_pred * y_true, axis=1, keepdims=True)
        true_sum = jnp.sum(y_true, axis=1, keepdims=True)
    else:
        labels = tgt_ref[...]                                  # (tile_n, 1) int32
        col = lax.broadcasted_iota(jnp.int32, (tile_n, num_classes), 1)
        hit = col == labels                                    # in-kernel one-hot
        tp = jnp.sum(jnp.where(hit, y_pred, 0.0), axis=1, keepdims=True)
        # one-hot row-sum is exactly 1 for a valid label.
        valid = jnp.logical_and(labels >= 0, labels < num_classes)
        true_sum = valid.astype(jnp.float32)                   # (tile_n, 1)

    epsf = jnp.float32(eps)
    precision = tp / (pred_sum + epsf)
    recall = tp / (true_sum + epsf)
    b2 = jnp.float32(beta2)
    fscore = (precision * recall) / (precision * b2 + recall + epsf) \
        * (jnp.float32(1.0) + b2)

    zero = jnp.float32(0.0)
    acc_ref[0] = acc_ref[0] + jnp.sum(jnp.where(row_valid, fscore, zero))
    acc_ref[1] = acc_ref[1] + jnp.sum(jnp.where(row_valid, precision, zero))
    acc_ref[2] = acc_ref[2] + jnp.sum(jnp.where(row_valid, recall, zero))

    @pl.when(i == pl.num_programs(1) - 1)
    def _finalize():
        # Encode the three partial sums on sublanes 0/1/2 of this chunk's
        # (1, 8, 128) output block.
        sub = lax.broadcasted_iota(jnp.int32, (1, 8, 128), 1)
        res = jnp.where(sub == 0, acc_ref[0],
              jnp.where(sub == 1, acc_ref[1],
              jnp.where(sub == 2, acc_ref[2], zero)))
        res_ref[...] = res


def fscore_pallas(output, target, *, threshold=0.5, beta=1, eps=1e-9,
                  tile_vmem_budget_bytes=8 * 1024 * 1024, num_chunks=2):
    """Fscore.forward(output, target) -> {'fscore', 'precision', 'recall'}.

    output: scores [N, C] (any float dtype; streamed natively, cast in-kernel)
    target: int labels [N] (one-hot built in-kernel) or same-shape [N, C] mask.
    """
    output = jnp.asarray(output)          # keep native dtype (no f32 upcast)
    n, c = output.shape
    target = jnp.asarray(target)

    dense_target = output.shape == target.shape
    if not dense_target:
        if not jnp.issubdtype(target.dtype, jnp.integer):
            raise ValueError("target must be integer labels [N] or an [N, C] mask")
        target = target.astype(jnp.int32).reshape(n, 1)   # tiny [N] vector only

    # --- tile sizing by VMEM footprint (lane dim pads to 128) -------------
    def _sub_mult(dt):
        return max(8, 32 // jnp.dtype(dt).itemsize)       # 8 f32 / 16 bf16 / 32 i8

    sub_mult = _sub_mult(output.dtype)
    if dense_target:
        sub_mult = max(sub_mult, _sub_mult(target.dtype))

    lane_c = _round_up(c, 128)
    vmem_row = lane_c * output.dtype.itemsize
    vmem_row += (lane_c * target.dtype.itemsize) if dense_target else 128 * 4

    tile_n = max(sub_mult,
                 (tile_vmem_budget_bytes // vmem_row) // sub_mult * sub_mult)
    tile_n = min(tile_n, _round_up(n, sub_mult))

    total_steps = -(-n // tile_n)
    num_chunks = max(1, min(int(num_chunks), total_steps))
    steps_per_chunk = -(-total_steps // num_chunks)
    last_block = total_steps - 1

    def data_map(chk, i):
        # Clamp so a trailing (fully out-of-range) chunk step still reads a
        # valid block; the kernel's row mask zeroes its contribution.
        return (jnp.minimum(chk * steps_per_chunk + i, last_block), 0)

    in_specs = [pl.BlockSpec((tile_n, c), data_map)]
    if dense_target:
        in_specs.append(pl.BlockSpec((tile_n, c), data_map))
    else:
        in_specs.append(pl.BlockSpec((tile_n, 1), data_map))

    kernel = functools.partial(
        _fscore_kernel,
        threshold=float(threshold),
        beta2=float(beta) ** 2,
        eps=float(eps),
        num_classes=c,
        dense_target=dense_target,
        n_rows=n,
        tile_n=tile_n,
        steps_per_chunk=steps_per_chunk,
    )

    # Double-buffered input tiles + margin; stays well under v7x's 64 MiB.
    in_vmem = 2 * tile_n * vmem_row
    vmem_limit = int(min(44 * 1024 * 1024,
                         max(in_vmem + 8 * 1024 * 1024, 16 * 1024 * 1024)))

    partials = pl.pallas_call(
        kernel,
        out_shape=jax.ShapeDtypeStruct((num_chunks, 8, 128), jnp.float32),
        grid_spec=pltpu.PrefetchScalarGridSpec(
            num_scalar_prefetch=0,
            grid=(num_chunks, steps_per_chunk),
            in_specs=in_specs,
            out_specs=pl.BlockSpec((1, 8, 128), lambda chk, i: (chk, 0, 0)),
            scratch_shapes=[pltpu.SMEM((3,), jnp.float32)],
        ),
        compiler_params=pltpu.CompilerParams(
            dimension_semantics=("parallel", "arbitrary"),
            vmem_limit_bytes=vmem_limit,
        ),
    )(output, target)

    inv_n = 1.0 / float(n)   # means over the true batch size
    fsum = jnp.sum(partials[:, 0, 0])
    psum = jnp.sum(partials[:, 1, 0])
    rsum = jnp.sum(partials[:, 2, 0])
    return {"fscore": fsum * inv_n, "precision": psum * inv_n, "recall": rsum * inv_n}


def _fscore_reference(output, target, *, threshold=0.5, beta=1, eps=1e-9):
    beta2 = float(beta) ** 2
    output = jnp.asarray(output).astype(jnp.float32)
    target = jnp.asarray(target)
    if output.shape != target.shape:
        target = jax.nn.one_hot(target, output.shape[1], dtype=jnp.float32)
    y_pred = (output >= threshold).astype(jnp.float32)
    y_true = target.astype(jnp.float32)
    tp = jnp.sum(y_pred * y_true, axis=1)
    precision = tp / (jnp.sum(y_pred, axis=1) + eps)
    recall = tp / (jnp.sum(y_true, axis=1) + eps)
    fscore = jnp.mean((precision * recall)
                      / (precision * beta2 + recall + eps) * (1.0 + beta2))
    return {"fscore": fscore,
            "precision": jnp.mean(precision),
            "recall": jnp.mean(recall)}


def _check(res, ref, atol):
    for name in ("fscore", "precision", "recall"):
        assert jnp.allclose(res[name], ref[name], atol=atol), (
            name, res[name], ref[name])


if __name__ == "__main__":
    key = jax.random.PRNGKey(0)
    k1, k2, k3, k4, k5, k6 = jax.random.split(key, 6)

    # 1) small f32 logits + int labels (one-hot built in-kernel).
    N, C = 8, 16
    logits = jax.random.normal(k1, (N, C), dtype=jnp.float32)
    labels = jax.random.randint(k2, (N,), 0, C, dtype=jnp.int32)
    res = fscore_pallas(logits, labels)
    jax.block_until_ready(res["fscore"])
    _check(res, _fscore_reference(logits, labels), atol=1e-5)

    # 2) dense same-shape float target (multi-label mask).
    tgt_dense = (jax.random.uniform(k3, (N, C)) > 0.7).astype(jnp.float32)
    res2 = fscore_pallas(logits, tgt_dense)
    jax.block_until_ready(res2["fscore"])
    _check(res2, _fscore_reference(logits, tgt_dense), atol=1e-5)

    # 3) ragged batch, native bf16 streaming, multi-step + 2-chunk grid
    #    (tiny tile budget forces several grid steps, incl. a clamped one).
    N3, C3 = 100, 16
    logits3 = jax.random.normal(k4, (N3, C3), dtype=jnp.float32).astype(jnp.bfloat16)
    labels3 = jax.random.randint(k5, (N3,), 0, C3, dtype=jnp.int32)
    res3 = fscore_pallas(logits3, labels3, tile_vmem_budget_bytes=16 * 1024)
    jax.block_until_ready(res3["fscore"])
    _check(res3, _fscore_reference(logits3, labels3), atol=1e-4)

    # 4) ragged batch, dense f32 target, multi-step grid.
    N4, C4 = 20, 8
    logits4 = jax.random.normal(k6, (N4, C4), dtype=jnp.float32)
    tgt4 = (jax.random.uniform(k3, (N4, C4)) > 0.6).astype(jnp.float32)
    res4 = fscore_pallas(logits4, tgt4, tile_vmem_budget_bytes=8 * 1024)
    jax.block_until_ready(res4["fscore"])
    _check(res4, _fscore_reference(logits4, tgt4), atol=1e-4)

    print("KERNEL_OK")
</pallas_src>

<mosaic_0001>
module attributes {stable_mosaic.version = 11 : i64} {
  func.func @_fscore_kernel(%arg0: i32, %arg1: i32, %arg2: memref<8x16xf32, #tpu.memory_space<vmem>>, %arg3: memref<8x1xi32, #tpu.memory_space<vmem>>, %arg4: memref<1x8x128xf32, #tpu.memory_space<vmem>>, %arg5: memref<3xf32, #tpu.memory_space<smem>>) attributes {dimension_semantics = [#tpu.dimension_semantics<parallel>, #tpu.dimension_semantics<arbitrary>], iteration_bounds = array<i64: 1, 1>, scalar_prefetch = 0 : i64, scratch_operands = 1 : i64, tpu.core_type = #tpu.core_type<tc>, window_params = [{transform_indices = @transform_0, window_bounds = array<i64: 8, 16>}, {transform_indices = @transform_1, window_bounds = array<i64: 8, 1>}, {transform_indices = @transform_2, window_bounds = array<i64: 1, 8, 128>}]} {
    %c0_i32 = arith.constant 0 : i32
    %0 = arith.cmpi eq, %arg1, %c0_i32 : i32
    %1 = arith.extui %0 : i1 to i32
    %c0_i32_0 = arith.constant 0 : i32
    %2 = arith.cmpi ne, %1, %c0_i32_0 : i32
    scf.if %2 {
      %cst_28 = arith.constant 0.000000e+00 : f32
      %c0_29 = arith.constant 0 : index
      %79 = memref.load %arg5[%c0_29] : memref<3xf32, #tpu.memory_space<smem>>
      memref.store %cst_28, %arg5[%c0_29] : memref<3xf32, #tpu.memory_space<smem>>
      %cst_30 = arith.constant 0.000000e+00 : f32
      %c1_31 = arith.constant 1 : index
      %80 = memref.load %arg5[%c1_31] : memref<3xf32, #tpu.memory_space<smem>>
      memref.store %cst_30, %arg5[%c1_31] : memref<3xf32, #tpu.memory_space<smem>>
      %cst_32 = arith.constant 0.000000e+00 : f32
      %c2_33 = arith.constant 2 : index
      %81 = memref.load %arg5[%c2_33] : memref<3xf32, #tpu.memory_space<smem>>
      memref.store %cst_32, %arg5[%c2_33] : memref<3xf32, #tpu.memory_space<smem>>
    } else {
    }
    %c1_i32 = arith.constant 1 : i32
    %3 = arith.muli %arg0, %c1_i32 : i32
    %4 = arith.addi %3, %arg1 : i32
    %c8_i32 = arith.constant 8 : i32
    %5 = arith.muli %4, %c8_i32 : i32
    %6 = tpu.iota {dimensions = array<i32: 0>} : vector<8x1xi32>
    %7 = vector.broadcast %5 : i32 to vector<8x1xi32>
    %8 = arith.addi %7, %6 : vector<8x1xi32>
    %c8_i32_1 = arith.constant 8 : i32
    %9 = vector.broadcast %c8_i32_1 : i32 to vector<8x1xi32>
    %10 = arith.cmpi slt, %8, %9 : vector<8x1xi32>
    %c0 = arith.constant 0 : index
    %c0_2 = arith.constant 0 : index
    %11 = vector.load %arg2[%c0, %c0_2] : memref<8x16xf32, #tpu.memory_space<vmem>>, vector<8x16xf32>
    %cst = arith.constant 5.000000e-01 : f32
    %12 = vector.broadcast %cst : f32 to vector<8x16xf32>
    %13 = arith.cmpf oge, %11, %12 : vector<8x16xf32>
    %14 = arith.extui %13 : vector<8x16xi1> to vector<8x16xi32>
    %15 = arith.sitofp %14 : vector<8x16xi32> to vector<8x16xf32>
    %cst_3 = arith.constant dense<0.000000e+00> : vector<8xf32>
    %16 = vector.multi_reduction <add>, %15, %cst_3 [1] : vector<8x16xf32> to vector<8xf32>
    %17 = vector.shape_cast %16 : vector<8xf32> to vector<8x1xf32>
    %c0_4 = arith.constant 0 : index
    %c0_5 = arith.constant 0 : index
    %18 = vector.load %arg3[%c0_4, %c0_5] : memref<8x1xi32, #tpu.memory_space<vmem>>, vector<8x1xi32>
    %19 = tpu.iota {dimensions = array<i32: 1>} : vector<8x16xi32>
    %20 = vector.broadcast %18 : vector<8x1xi32> to vector<8x16xi32>
    %21 = arith.cmpi eq, %19, %20 : vector<8x16xi32>
    %cst_6 = arith.constant 0.000000e+00 : f32
    %22 = vector.broadcast %cst_6 : f32 to vector<8x16xf32>
    %23 = arith.select %21, %15, %22 : vector<8x16xi1>, vector<8x16xf32>
    %cst_7 = arith.constant dense<0.000000e+00> : vector<8xf32>
    %24 = vector.multi_reduction <add>, %23, %cst_7 [1] : vector<8x16xf32> to vector<8xf32>
    %25 = vector.shape_cast %24 : vector<8xf32> to vector<8x1xf32>
    %c0_i32_8 = arith.constant 0 : i32
    %26 = vector.broadcast %c0_i32_8 : i32 to vector<8x1xi32>
    %27 = arith.cmpi sge, %18, %26 : vector<8x1xi32>
    %c16_i32 = arith.constant 16 : i32
    %28 = vector.broadcast %c16_i32 : i32 to vector<8x1xi32>
    %29 = arith.cmpi slt, %18, %28 : vector<8x1xi32>
    %30 = arith.andi %27, %29 : vector<8x1xi1>
    %31 = arith.extui %30 : vector<8x1xi1> to vector<8x1xi32>
    %32 = arith.sitofp %31 : vector<8x1xi32> to vector<8x1xf32>
    %cst_9 = arith.constant 9.99999971E-10 : f32
    %33 = vector.broadcast %cst_9 : f32 to vector<8x1xf32>
    %34 = arith.addf %17, %33 : vector<8x1xf32>
    %35 = arith.divf %25, %34 : vector<8x1xf32>
    %cst_10 = arith.constant 9.99999971E-10 : f32
    %36 = vector.broadcast %cst_10 : f32 to vector<8x1xf32>
    %37 = arith.addf %32, %36 : vector<8x1xf32>
    %38 = arith.divf %25, %37 : vector<8x1xf32>
    %39 = arith.mulf %35, %38 : vector<8x1xf32>
    %cst_11 = arith.constant 1.000000e+00 : f32
    %40 = vector.broadcast %cst_11 : f32 to vector<8x1xf32>
    %41 = arith.mulf %35, %40 : vector<8x1xf32>
    %42 = arith.addf %41, %38 : vector<8x1xf32>
    %cst_12 = arith.constant 9.99999971E-10 : f32
    %43 = vector.broadcast %cst_12 : f32 to vector<8x1xf32>
    %44 = arith.addf %42, %43 : vector<8x1xf32>
    %45 = arith.divf %39, %44 : vector<8x1xf32>
    %cst_13 = arith.constant 1.000000e+00 : f32
    %cst_14 = arith.constant 1.000000e+00 : f32
    %46 = arith.addf %cst_13, %cst_14 : f32
    %47 = vector.broadcast %46 : f32 to vector<8x1xf32>
    %48 = arith.mulf %45, %47 : vector<8x1xf32>
    %c0_15 = arith.constant 0 : index
    %49 = memref.load %arg5[%c0_15] : memref<3xf32, #tpu.memory_space<smem>>
    %cst_16 = arith.constant 0.000000e+00 : f32
    %50 = vector.broadcast %cst_16 : f32 to vector<8x1xf32>
    %51 = arith.select %10, %48, %50 : vector<8x1xi1>, vector<8x1xf32>
    %52 = vector.shape_cast %51 : vector<8x1xf32> to vector<1x8x1xf32>
    %cst_17 = arith.constant dense<0.000000e+00> : vector<1xf32>
    %53 = vector.multi_reduction <add>, %52, %cst_17 [1, 2] : vector<1x8x1xf32> to vector<1xf32>
    %54 = vector.shape_cast %53 : vector<1xf32> to vector<1x1x1xf32>
    %55 = vector.extract %54[0, 0, 0] : f32 from vector<1x1x1xf32>
    %56 = arith.addf %49, %55 : f32
    %c0_18 = arith.constant 0 : index
    %57 = memref.load %arg5[%c0_18] : memref<3xf32, #tpu.memory_space<smem>>
    memref.store %56, %arg5[%c0_18] : memref<3xf32, #tpu.memory_space<smem>>
    %c1 = arith.constant 1 : index
    %58 = memref.load %arg5[%c1] : memref<3xf32, #tpu.memory_space<smem>>
    %cst_19 = arith.constant 0.000000e+00 : f32
    %59 = vector.broadcast %cst_19 : f32 to vector<8x1xf32>
    %60 = arith.select %10, %35, %59 : vector<8x1xi1>, vector<8x1xf32>
    %61 = vector.shape_cast %60 : vector<8x1xf32> to vector<1x8x1xf32>
    %cst_20 = arith.constant dense<0.000000e+00> : vector<1xf32>
    %62 = vector.multi_reduction <add>, %61, %cst_20 [1, 2] : vector<1x8x1xf32> to vector<1xf32>
    %63 = vector.shape_cast %62 : vector<1xf32> to vector<1x1x1xf32>
    %64 = vector.extract %63[0, 0, 0] : f32 from vector<1x1x1xf32>
    %65 = arith.addf %58, %64 : f32
    %c1_21 = arith.constant 1 : index
    %66 = memref.load %arg5[%c1_21] : memref<3xf32, #tpu.memory_space<smem>>
    memref.store %65, %arg5[%c1_21] : memref<3xf32, #tpu.memory_space<smem>>
    %c2 = arith.constant 2 : index
    %67 = memref.load %arg5[%c2] : memref<3xf32, #tpu.memory_space<smem>>
    %cst_22 = arith.constant 0.000000e+00 : f32
    %68 = vector.broadcast %cst_22 : f32 to vector<8x1xf32>
    %69 = arith.select %10, %38, %68 : vector<8x1xi1>, vector<8x1xf32>
    %70 = vector.shape_cast %69 : vector<8x1xf32> to vector<1x8x1xf32>
    %cst_23 = arith.constant dense<0.000000e+00> : vector<1xf32>
    %71 = vector.multi_reduction <add>, %70, %cst_23 [1, 2] : vector<1x8x1xf32> to vector<1xf32>
    %72 = vector.shape_cast %71 : vector<1xf32> to vector<1x1x1xf32>
    %73 = vector.extract %72[0, 0, 0] : f32 from vector<1x1x1xf32>
    %74 = arith.addf %67, %73 : f32
    %c2_24 = arith.constant 2 : index
    %75 = memref.load %arg5[%c2_24] : memref<3xf32, #tpu.memory_space<smem>>
    memref.store %74, %arg5[%c2_24] : memref<3xf32, #tpu.memory_space<smem>>
    %c0_i32_25 = arith.constant 0 : i32
    %76 = arith.cmpi eq, %arg1, %c0_i32_25 : i32
    %77 = arith.extui %76 : i1 to i32
    %cst_26 = arith.constant 0.000000e+00 : f32
    %c0_i32_27 = arith.constant 0 : i32
    %78 = arith.cmpi ne, %77, %c0_i32_27 : i32
    scf.if %78 {
      %79 = tpu.iota {dimensions = array<i32: 1>} : vector<1x8x128xi32>
      %c0_i32_28 = arith.constant 0 : i32
      %80 = vector.broadcast %c0_i32_28 : i32 to vector<1x8x128xi32>
      %81 = arith.cmpi eq, %79, %80 : vector<1x8x128xi32>
      %c0_29 = arith.constant 0 : index
      %82 = memref.load %arg5[%c0_29] : memref<3xf32, #tpu.memory_space<smem>>
      %c1_i32_30 = arith.constant 1 : i32
      %83 = vector.broadcast %c1_i32_30 : i32 to vector<1x8x128xi32>
      %84 = arith.cmpi eq, %79, %83 : vector<1x8x128xi32>
      %c1_31 = arith.constant 1 : index
      %85 = memref.load %arg5[%c1_31] : memref<3xf32, #tpu.memory_space<smem>>
      %c2_i32 = arith.constant 2 : i32
      %86 = vector.broadcast %c2_i32 : i32 to vector<1x8x128xi32>
      %87 = arith.cmpi eq, %79, %86 : vector<1x8x128xi32>
      %c2_32 = arith.constant 2 : index
      %88 = memref.load %arg5[%c2_32] : memref<3xf32, #tpu.memory_space<smem>>
      %89 = vector.broadcast %88 : f32 to vector<1x8x128xf32>
      %90 = vector.broadcast %cst_26 : f32 to vector<1x8x128xf32>
      %91 = arith.select %87, %89, %90 : vector<1x8x128xi1>, vector<1x8x128xf32>
      %92 = vector.broadcast %85 : f32 to vector<1x8x128xf32>
      %93 = arith.select %84, %92, %91 : vector<1x8x128xi1>, vector<1x8x128xf32>
      %94 = vector.broadcast %82 : f32 to vector<1x8x128xf32>
      %95 = arith.select %81, %94, %93 : vector<1x8x128xi1>, vector<1x8x128xf32>
      %c0_33 = arith.constant 0 : index
      %c0_34 = arith.constant 0 : index
      %c0_35 = arith.constant 0 : index
      %96 = vector.load %arg4[%c0_33, %c0_34, %c0_35] : memref<1x8x128xf32, #tpu.memory_space<vmem>>, vector<1x8x128xf32>
      tpu.vector_store %arg4[%c0_33, %c0_34, %c0_35], %95 {strides = array<i32>} : memref<1x8x128xf32, #tpu.memory_space<vmem>>, vector<1x8x128xf32>,
    } else {
    }
    return
  }
  func.func @transform_0(%arg0: i32, %arg1: i32) -> (i32, i32) {
    %c1_i32 = arith.constant 1 : i32
    %0 = arith.muli %arg0, %c1_i32 : i32
    %1 = arith.addi %0, %arg1 : i32
    %c0_i32 = arith.constant 0 : i32
    %2 = arith.minsi %1, %c0_i32 : i32
    %c0_i32_0 = arith.constant 0 : i32
    %c0_i32_1 = arith.constant 0 : i32
    return %2, %c0_i32_0 : i32, i32
  }
  func.func @transform_1(%arg0: i32, %arg1: i32) -> (i32, i32) {
    %c1_i32 = arith.constant 1 : i32
    %0 = arith.muli %arg0, %c1_i32 : i32
    %1 = arith.addi %0, %arg1 : i32
    %c0_i32 = arith.constant 0 : i32
    %2 = arith.minsi %1, %c0_i32 : i32
    %c0_i32_0 = arith.constant 0 : i32
    %c0_i32_1 = arith.constant 0 : i32
    return %2, %c0_i32_0 : i32, i32
  }
  func.func @transform_2(%arg0: i32, %arg1: i32) -> (i32, i32, i32) {
    %c0_i32 = arith.constant 0 : i32
    %c0_i32_0 = arith.constant 0 : i32
    %c0_i32_1 = arith.constant 0 : i32
    return %arg0, %c0_i32, %c0_i32_0 : i32, i32, i32
  }
}

</mosaic_0001>

<bundles_post_ra>
// kernel: tpu_custom_call.1
= control target key start
LH: loop header
LB: loop body
LE: loop exit
PB: predicated region body
PF: predicated region fallthrough
CT: control target
= control target key end

     0   :  { %v251_v1 = vmov 0   ;;  %s278_s0 = inlined_call_operand.vmem [shape: f32[8,16], index: 0, kind: input, shape index: {}]   ;;  %s279_s1 = inlined_call_operand.vmem [shape: s32[8,1], index: 1, kind: input, shape index: {}]   ;;  %s280_s2 = inlined_call_operand.hbm [shape: f32[1,8,128], index: 2, kind: output, shape index: {}]  }
   0x1   :  { %v91_v0 = vld [vmem:[%s279_s1] sm:$0xff]  ;;  %222 = vset.pattern.permute.xlu0 %v251_v1 }
   0x2   :  { %vm102_vm0 = vcmp.ge.s32.totalorder %v91_v0, 0  ;;  %vm103_vm1 = vcmp.lt.s32.totalorder %v91_v0, 16 }
   0x3   :  { %7 = vsyncpa [#allocation4], 0  ;;  %95 = vperm.xlu0 %222, %v91_v0   ;;  %v252_v2 = vmov 0.0   ;;  %v83_v4 = vld [vmem:[%s278_s0] sm:$0xff]  ;;  %vm87_vm4 = vcmask 130048   ;;  %v78_v7 = vlaneseq  ;;  %vm121_vm6 = vcmask 7168  }
   0x4   :  { %vm104_vm2 = vmand %vm102_vm0, %vm103_vm1  ;;  %vm84_vm3 = vcmp.ge.f32.partialorder %v83_v4, 0.5  ;;  %s253_s14 = smov [#allocation3]  }
   0x5   :  { %v208_v3 = vsel %vm104_vm2, 1.0, %v252_v2  ;;  %v207_v5 = vsel %vm84_vm3, 1.0, %v252_v2  ;;  %v93_v8 = vand.u32 127, %v78_v7  ;;  %v79_v50 = vshrl.u32 %v78_v7, 7  ;;  %s187_s15 = sshll.u32 %s253_s14, 4  ;;  %s188_s15 = int_to_ptr.vmem [resolvable:$true] %s187_s15 }
   0x6   :  { %v88_v6 = vsel %vm87_vm4, %v207_v5, 0.0  ;;  %v110_v13 = vadd.f32 1e-09, %v208_v3  ;;  %s229_s16 = scalar_lea.vmem %s188_s15, 128  ;;  %p234_p1 = scmp.lt.s32.totalorder %s188_s15, %s188_s15 }
   0x7   :  { %vm172_vm7 = vcmp.eq.s32.totalorder %v79_v50, 2  ;;  %vm170_vm8 = vcmp.eq.s32.totalorder %v79_v50, 1  ;;  %vm168_vm9 = vcmp.eq.s32.totalorder %v79_v50, 0  ;;  %p230_p0 = scmp.ne.s32.totalorder %s188_s15, %s229_s16  ;;  %p235_p2 = scmp.lt.s32.totalorder %s229_s16, %s229_s16 }
   0x8   :  { %223 = vrcp.f32 %v110_v13 }
   0x9   :  { %p236_p3 = por %p235_p2, %p234_p1 }
   0xb   :  { %p237_p4 = pnand %p236_p3, %p230_p0 }
  0x15   :  { %v224_v15 = vpop.eup %223 }
  0x22   :  { %89 = vadd.xlane.f32.xlu0 %v88_v6 }
  0x7e   :  { %v96_v9 = vpop.permute.xlu0 %95 }
  0x7f   :  { %vm97_vm5 = vcmp.eq.s32.totalorder %v93_v8, %v96_v9 }
  0x80   :  { %v98_v10 = vsel %vm97_vm5, %v207_v5, 0.0 }
  0x81   :  { %v99_v11 = vsel %vm87_vm4, %v98_v10, 0.0 }
  0x82   :  { %100 = vadd.xlane.f32.xlu1 %v99_v11 }
  0xab   :  { %v90_v12 = vpop.xlane.xlu0 %89 }
  0xac   :  { %v107_v14 = vadd.f32 1e-09, %v90_v12 }
  0xae   :  { %225 = vrcp.f32 %v107_v14 }
  0xbb   :  { %v226_v16 = vpop.eup %225 }
 0x10b   :  { %v101_v17 = vpop.xlane.xlu1 %100 }
 0x10c   :  { %v109_v18 = vmul.f32 %v226_v16, %v101_v17  ;;  %v112_v19 = vmul.f32 %v224_v15, %v101_v17 }
 0x10e   :  { %v114_v20 = vadd.f32 %v112_v19, %v109_v18  ;;  %v137_v21 = vsel %vm121_vm6, %v109_v18, 0.0  ;;  %v113_v23 = vmul.f32 %v112_v19, %v109_v18  ;;  %v152_v28 = vsel %vm121_vm6, %v112_v19, 0.0 }
 0x10f   :  { %138 = vadd.xlane.f32.xlu1 %v137_v21 }
 0x110   :  { %v115_v22 = vadd.f32 1e-09, %v114_v20 }
 0x112   :  { %227 = vrcp.f32 %v115_v22 }
 0x11f   :  { %v228_v24 = vpop.eup %227 }
 0x120   :  { %v117_v25 = vmul.f32 %v228_v24, %v113_v23 }
 0x122   :  { %v118_v26 = vmul.f32 2.0, %v117_v25 }
 0x124   :  { %v122_v27 = vsel %vm121_vm6, %v118_v26, 0.0 }
 0x125   :  { %123 = vadd.xlane.f32.xlu1 %v122_v27 }
 0x129   :  { %153 = vadd.xlane.f32.xlu1 %v152_v28 }
 0x198   :  { %v139_v29 = vpop.xlane.xlu1 %138 }
 0x199   :  { %v140_v30 = vrot.slane %v139_v29, 4 }
 0x19b   :  { %v141_v31 = vadd.f32 %v140_v30, %v139_v29 }
 0x19d   :  { %v142_v32 = vrot.slane %v141_v31, 2 }
 0x19f   :  { %v143_v37 = vadd.f32 %v142_v32, %v141_v31 }
 0x1a1   :  { %v144_v42 = vrot.slane %v143_v37, 1 }
 0x1a3   :  { %v145_v47 = vadd.f32 %v144_v42, %v143_v37 }
 0x1ae   :  { %v124_v33 = vpop.xlane.xlu1 %123 }
 0x1af   :  { %v125_v34 = vrot.slane %v124_v33, 4 }
 0x1b1   :  { %v126_v35 = vadd.f32 %v125_v34, %v124_v33 }
 0x1b2   :  { %v154_v36 = vpop.xlane.xlu1 %153 }
 0x1b3   :  { %v127_v38 = vrot.slane %v126_v35, 2  ;;  %v155_v39 = vrot.slane %v154_v36, 4 }
 0x1b5   :  { %v156_v40 = vadd.f32 %v155_v39, %v154_v36  ;;  %v128_v41 = vadd.f32 %v127_v38, %v126_v35 }
 0x1b7   :  { %v157_v43 = vrot.slane %v156_v40, 2  ;;  %v129_v44 = vrot.slane %v128_v41, 1 }
 0x1b9   :  { %v158_v45 = vadd.f32 %v157_v43, %v156_v40  ;;  %v130_v46 = vadd.f32 %v129_v44, %v128_v41 }
 0x1bb   :  { %213 = vpush %v130_v46  ;;  %v159_v48 = vrot.slane %v158_v45, 1 }
 0x1bc   :  { %215 = vpush %v145_v47 }
 0x1bd   :  { %v160_v49 = vadd.f32 %v159_v48, %v158_v45 }
 0x1bf   :  { %217 = vpush %v160_v49 }
 0x1ec   :  { %s214_s0 = spop %213 }
 0x1ed   :  { %s216_s1 = spop %215  ;;  %v178_v54 = vstv %s214_s0 }
 0x1ee   :  { %v176_v52 = vstv %s216_s1 }
 0x1f0   :  { %s218_s13 = spop %217 }
 0x1f1   :  { %v174_v51 = vstv %s218_s13 }
 0x1f2   :  { %v175_v53 = vsel %vm172_vm7, %v174_v51, 0.0 }
 0x1f3   :  { %v177_v55 = vsel %vm170_vm8, %v176_v52, %v175_v53 }
 0x1f4   :  { %v179_v56 = vsel %vm168_vm9, %v178_v54, %v177_v55 }
 0x1f5   :  { %180 = vst [vmem:[#allocation3] sm:$0xff] %v179_v56 }
 0x1f6   :  { %240 = shalt.err (!%p237_p4)
}
 0x1f7   :  { %190 = dma.vmem_to_hbm [thread:$0]  %s188_s15, 128, %s280_s2, [#allocation4]  }
 0x1f8   :  { %249 = dma.done.wait [#allocation4], 128  }
 0x1f9   :  { %250 = vsyncadd [#allocation4], 4294967168 }
 0x1fa   :  { %194 = vsyncpa [#allocation4], 1 }

</bundles_post_ra>
